<compile_context>
chip_gen: v5e
topology: v5e:2x2
jax: 0.10.0
libtpu: 0.0.40
codegen_flags: <defaults>
</compile_context>

<pallas_src>
import functools
import math

import jax
import jax.numpy as jnp
import numpy as np
from jax.experimental import pallas as pl
from jax.experimental.pallas import tpu as pltpu


def _round_up(x, m):
    return -(-x // m) * m


def _gjs_kernel(*refs, dist_num, weights, eps, inv_total, m_true, tm,
                tiles_per_shard, needs_mask):
    """refs = (x_0, ..., x_{D-1}, out, acc).

    x_d  : (1, C, tm) tile of logits for prediction d (batch n, lane tile j).
    out  : (1, 1, 1) f32 partial loss for the current shard (parallel axis).
    acc  : (1, C, tm) f32 VMEM scratch, element-wise partial sums.
    """
    x_refs = refs[:dist_num]
    out_ref = refs[dist_num]
    acc_ref = refs[dist_num + 1]

    s = pl.program_id(0)          # shard of the M-tile axis ("parallel")
    n = pl.program_id(1)          # batch index
    j = pl.program_id(2)          # M-tile within this shard

    is_first = jnp.logical_and(n == 0, j == 0)
    is_last = jnp.logical_and(n == pl.num_programs(1) - 1,
                              j == pl.num_programs(2) - 1)

    @pl.when(is_first)
    def _():
        acc_ref[...] = jnp.zeros_like(acc_ref)

    log_eps = math.log(eps)

    # Per-distribution softmax over the channel (sublane) axis.
    ps = []
    log_ps = []
    for d in range(dist_num):
        x = x_refs[d][...].astype(jnp.float32)                 # (1, C, tm)
        m = jnp.max(x, axis=1, keepdims=True)                  # (1, 1, tm)
        shifted = x - m
        e = jnp.exp(shifted)
        denom = jnp.sum(e, axis=1, keepdims=True)              # (1, 1, tm)
        # EUP reciprocal + one Newton step: keeps the divide off the VPU while
        # staying at ~f32 accuracy (parity with the exact reference).
        inv = pl.reciprocal(denom, approx=True)
        inv = inv * (2.0 - denom * inv)
        ps.append(e * inv)
        # log-softmax identity: only D logs per lane column instead of D*C.
        log_ps.append(shifted - jnp.log(denom))

    # Weighted mixture distribution, clamped at eps.
    mean_dist = jnp.float32(weights[0]) * ps[0]
    for d in range(1, dist_num):
        mean_dist = mean_dist + jnp.float32(weights[d]) * ps[d]
    mean_dist = jnp.maximum(mean_dist, jnp.float32(eps))
    log_mean = jnp.log(mean_dist)

    # sum_d w_d * p_d * (max(log p_d, log eps) - log mean_dist)
    # (softmax output is strictly positive, so the reference's `p > 0` select
    #  is always true and is dropped.)
    contrib = jnp.zeros_like(mean_dist)
    for d in range(dist_num):
        lp = jnp.maximum(log_ps[d], jnp.float32(log_eps))
        contrib = contrib + jnp.float32(weights[d]) * (ps[d] * (lp - log_mean))

    if needs_mask:
        # Zero out padded lane columns (M was zero-padded up to a tile multiple).
        col0 = (s * tiles_per_shard + j) * tm
        lane = jax.lax.broadcasted_iota(jnp.int32, contrib.shape, 2)
        contrib = jnp.where(col0 + lane < m_true, contrib,
                            jnp.zeros_like(contrib))

    # Element-wise accumulation only; the single cross-lane reduction happens
    # once per shard in the final step below.
    acc_ref[...] += contrib

    @pl.when(is_last)
    def _():
        total = jnp.sum(acc_ref[...]) * jnp.float32(inv_total)
        out_ref[...] = jnp.zeros_like(out_ref) + total


def generalized_js_div(preds, weights=None, eps=1e-4, tm=8192, max_shards=2):
    """preds: list of dist_num logit arrays with identical NCHW shape."""
    dist_num = len(preds)
    if weights:
        weights = tuple(float(w) / dist_num for w in weights)
    else:
        weights = tuple([1.0 / dist_num] * dist_num)

    N, C, H, W = preds[0].shape
    M = H * W

    # Lane tile: large (amortizes per-step overhead), multiple of 128, no
    # larger than M rounded up to a lane multiple.
    tm = max(128, min(_round_up(int(tm), 128), _round_up(M, 128)))
    m_tiles = -(-M // tm)

    # Leading "parallel" axis: splits the M tiles across the (up to) 2
    # TensorCores of a v7x chip; on 1-TC chips it is just a short serial axis.
    n_shards = max(1, min(int(max_shards), m_tiles))
    tiles_per_shard = -(-m_tiles // n_shards)
    m_pad = n_shards * tiles_per_shard * tm
    needs_mask = (m_pad != M)

    # NCHW -> (N, C, H*W) is a free, contiguous reshape: no stack/transpose,
    # no extra HBM pass. Inputs keep their HBM dtype (bf16 stays bf16); the
    # kernel upcasts to f32.
    xs = [p.reshape(N, C, M) for p in preds]
    if needs_mask:
        xs = [jnp.pad(x, ((0, 0), (0, 0), (0, m_pad - M))) for x in xs]

    kernel = functools.partial(
        _gjs_kernel,
        dist_num=dist_num,
        weights=weights,
        eps=float(eps),
        inv_total=1.0 / float(N * C * H * W),
        m_true=M,
        tm=tm,
        tiles_per_shard=tiles_per_shard,
        needs_mask=needs_mask,
    )

    # NOTE: with C < 8 (f32) each (C, tm) slab fills only C of a vreg's 8
    # sublanes (~2x waste at C=4). Packing spatial columns into the unused
    # sublanes would require exactly the strided HBM relayout this version
    # removed, so it is intentionally not done for this memory-bound kernel.
    c_pad = _round_up(C, 8)
    in_bytes = 2 * dist_num * c_pad * tm * preds[0].dtype.itemsize  # dbl-buffered
    tmp_bytes = (3 * dist_num + 8) * c_pad * tm * 4                 # f32 temps + acc
    vmem_limit = int(min(48 * 1024 * 1024,                          # v7x-safe cap
                         max(32 * 1024 * 1024, 2 * (in_bytes + tmp_bytes))))

    in_map = lambda s, n, j: (n, 0, s * tiles_per_shard + j)
    out = pl.pallas_call(
        kernel,
        out_shape=jax.ShapeDtypeStruct((n_shards, 1, 1), jnp.float32),
        grid_spec=pltpu.PrefetchScalarGridSpec(
            num_scalar_prefetch=0,
            grid=(n_shards, N, tiles_per_shard),
            in_specs=[pl.BlockSpec((1, C, tm), in_map)] * dist_num,
            out_specs=pl.BlockSpec((1, 1, 1), lambda s, n, j: (s, 0, 0)),
            scratch_shapes=[pltpu.VMEM((1, C, tm), jnp.float32)],
        ),
        compiler_params=pltpu.CompilerParams(
            dimension_semantics=("parallel", "arbitrary", "arbitrary"),
            vmem_limit_bytes=vmem_limit,
        ),
    )(*xs)
    # One partial per shard (<= 2 values): sum them in the wrapper.
    return jnp.sum(out)


def _reference_gjs(preds, weights=None, eps=1e-4):
    dist_num = len(preds)
    if weights:
        weights = [float(w) / dist_num for w in weights]
    else:
        weights = [1.0 / dist_num] * dist_num
    ps = [jax.nn.softmax(p.astype(jnp.float32), axis=1) for p in preds]
    mean_dist = sum(w * p for w, p in zip(weights, ps))
    mean_dist = jnp.maximum(mean_dist, eps)
    loss = jnp.float32(0.0)
    for w, p in zip(weights, ps):
        out = p * (jnp.log(jnp.maximum(p, eps)) - jnp.log(jnp.maximum(mean_dist, eps)))
        out = jnp.where(p > 0, out, jnp.zeros_like(out))
        loss = loss + w * jnp.mean(out)
    return loss


if __name__ == "__main__":
    key = jax.random.PRNGKey(0)
    k0, k1, k2, k3 = jax.random.split(key, 4)

    # Case 1: dist_num = 2, NCHW logits, M divisible by the lane tile.
    preds1 = [jax.random.normal(k0, (2, 4, 16, 16), dtype=jnp.float32),
              jax.random.normal(k1, (2, 4, 16, 16), dtype=jnp.float32)]
    loss1 = jax.block_until_ready(generalized_js_div(preds1))
    ref1 = jax.block_until_ready(_reference_gjs(preds1))
    np.testing.assert_allclose(np.asarray(loss1), np.asarray(ref1),
                               rtol=1e-4, atol=1e-6)

    # Case 2: non-divisible spatial size + explicit weights -> exercises the
    # multi-tile / 2-shard / zero-pad + lane-mask path.
    preds2 = [jax.random.normal(k2, (2, 4, 24, 24), dtype=jnp.float32),
              jax.random.normal(k3, (2, 4, 24, 24), dtype=jnp.float32)]
    loss2 = jax.block_until_ready(
        generalized_js_div(preds2, weights=[1.0, 3.0], tm=256))
    ref2 = jax.block_until_ready(_reference_gjs(preds2, weights=[1.0, 3.0]))
    np.testing.assert_allclose(np.asarray(loss2), np.asarray(ref2),
                               rtol=1e-4, atol=1e-6)

    print("KERNEL_OK")
</pallas_src>

<mosaic_0001>
module attributes {stable_mosaic.version = 11 : i64} {
  func.func @_gjs_kernel(%arg0: i32, %arg1: i32, %arg2: i32, %arg3: memref<1x4x256xf32, #tpu.memory_space<vmem>>, %arg4: memref<1x4x256xf32, #tpu.memory_space<vmem>>, %arg5: memref<1x1x1xf32, #tpu.memory_space<vmem>>, %arg6: memref<1x4x256xf32, #tpu.memory_space<vmem>>) attributes {dimension_semantics = [#tpu.dimension_semantics<parallel>, #tpu.dimension_semantics<arbitrary>, #tpu.dimension_semantics<arbitrary>], iteration_bounds = array<i64: 1, 2, 1>, scalar_prefetch = 0 : i64, scratch_operands = 1 : i64, tpu.core_type = #tpu.core_type<tc>, window_params = [{transform_indices = @transform_0, window_bounds = array<i64: 1, 4, 256>}, {transform_indices = @transform_1, window_bounds = array<i64: 1, 4, 256>}, {transform_indices = @transform_2, window_bounds = array<i64: 1, 1, 1>}]} {
    %c0_i32 = arith.constant 0 : i32
    %0 = arith.cmpi eq, %arg1, %c0_i32 : i32
    %c0_i32_0 = arith.constant 0 : i32
    %1 = arith.cmpi eq, %arg2, %c0_i32_0 : i32
    %2 = arith.andi %0, %1 : i1
    %c1_i32 = arith.constant 1 : i32
    %3 = arith.cmpi eq, %arg1, %c1_i32 : i32
    %c0_i32_1 = arith.constant 0 : i32
    %4 = arith.cmpi eq, %arg2, %c0_i32_1 : i32
    %5 = arith.andi %3, %4 : i1
    %6 = arith.extui %2 : i1 to i32
    %c0_i32_2 = arith.constant 0 : i32
    %7 = arith.cmpi ne, %6, %c0_i32_2 : i32
    scf.if %7 {
      %cst_28 = arith.constant 0.000000e+00 : f32
      %72 = vector.broadcast %cst_28 : f32 to vector<1x4x256xf32>
      %c0_29 = arith.constant 0 : index
      %c0_30 = arith.constant 0 : index
      %c0_31 = arith.constant 0 : index
      %73 = vector.load %arg6[%c0_29, %c0_30, %c0_31] : memref<1x4x256xf32, #tpu.memory_space<vmem>>, vector<1x4x256xf32>
      tpu.vector_store %arg6[%c0_29, %c0_30, %c0_31], %72 {strides = array<i32>} : memref<1x4x256xf32, #tpu.memory_space<vmem>>, vector<1x4x256xf32>,
    } else {
    }
    %c0 = arith.constant 0 : index
    %c0_3 = arith.constant 0 : index
    %c0_4 = arith.constant 0 : index
    %8 = vector.load %arg3[%c0, %c0_3, %c0_4] : memref<1x4x256xf32, #tpu.memory_space<vmem>>, vector<1x4x256xf32>
    %cst = arith.constant dense<0xFF800000> : vector<1x256xf32>
    %9 = vector.multi_reduction <maximumf>, %8, %cst [1] : vector<1x4x256xf32> to vector<1x256xf32>
    %10 = vector.shape_cast %9 : vector<1x256xf32> to vector<1x1x256xf32>
    %11 = vector.broadcast %10 : vector<1x1x256xf32> to vector<1x4x256xf32>
    %12 = arith.subf %8, %11 : vector<1x4x256xf32>
    %13 = math.exp %12 : vector<1x4x256xf32>
    %cst_5 = arith.constant dense<0.000000e+00> : vector<1x256xf32>
    %14 = vector.multi_reduction <add>, %13, %cst_5 [1] : vector<1x4x256xf32> to vector<1x256xf32>
    %15 = vector.shape_cast %14 : vector<1x256xf32> to vector<1x1x256xf32>
    %16 = tpu.reciprocal %15 {approx = true} : vector<1x1x256xf32> -> vector<1x1x256xf32>
    %17 = arith.mulf %15, %16 : vector<1x1x256xf32>
    %cst_6 = arith.constant 2.000000e+00 : f32
    %18 = vector.broadcast %cst_6 : f32 to vector<1x1x256xf32>
    %19 = arith.subf %18, %17 : vector<1x1x256xf32>
    %20 = arith.mulf %16, %19 : vector<1x1x256xf32>
    %21 = vector.broadcast %20 : vector<1x1x256xf32> to vector<1x4x256xf32>
    %22 = arith.mulf %13, %21 : vector<1x4x256xf32>
    %23 = math.log %15 : vector<1x1x256xf32>
    %24 = vector.broadcast %23 : vector<1x1x256xf32> to vector<1x4x256xf32>
    %25 = arith.subf %12, %24 : vector<1x4x256xf32>
    %c0_7 = arith.constant 0 : index
    %c0_8 = arith.constant 0 : index
    %c0_9 = arith.constant 0 : index
    %26 = vector.load %arg4[%c0_7, %c0_8, %c0_9] : memref<1x4x256xf32, #tpu.memory_space<vmem>>, vector<1x4x256xf32>
    %cst_10 = arith.constant dense<0xFF800000> : vector<1x256xf32>
    %27 = vector.multi_reduction <maximumf>, %26, %cst_10 [1] : vector<1x4x256xf32> to vector<1x256xf32>
    %28 = vector.shape_cast %27 : vector<1x256xf32> to vector<1x1x256xf32>
    %29 = vector.broadcast %28 : vector<1x1x256xf32> to vector<1x4x256xf32>
    %30 = arith.subf %26, %29 : vector<1x4x256xf32>
    %31 = math.exp %30 : vector<1x4x256xf32>
    %cst_11 = arith.constant dense<0.000000e+00> : vector<1x256xf32>
    %32 = vector.multi_reduction <add>, %31, %cst_11 [1] : vector<1x4x256xf32> to vector<1x256xf32>
    %33 = vector.shape_cast %32 : vector<1x256xf32> to vector<1x1x256xf32>
    %34 = tpu.reciprocal %33 {approx = true} : vector<1x1x256xf32> -> vector<1x1x256xf32>
    %35 = arith.mulf %33, %34 : vector<1x1x256xf32>
    %cst_12 = arith.constant 2.000000e+00 : f32
    %36 = vector.broadcast %cst_12 : f32 to vector<1x1x256xf32>
    %37 = arith.subf %36, %35 : vector<1x1x256xf32>
    %38 = arith.mulf %34, %37 : vector<1x1x256xf32>
    %39 = vector.broadcast %38 : vector<1x1x256xf32> to vector<1x4x256xf32>
    %40 = arith.mulf %31, %39 : vector<1x4x256xf32>
    %41 = math.log %33 : vector<1x1x256xf32>
    %42 = vector.broadcast %41 : vector<1x1x256xf32> to vector<1x4x256xf32>
    %43 = arith.subf %30, %42 : vector<1x4x256xf32>
    %cst_13 = arith.constant 5.000000e-01 : f32
    %44 = vector.broadcast %cst_13 : f32 to vector<1x4x256xf32>
    %45 = arith.mulf %44, %22 : vector<1x4x256xf32>
    %cst_14 = arith.constant 5.000000e-01 : f32
    %46 = vector.broadcast %cst_14 : f32 to vector<1x4x256xf32>
    %47 = arith.mulf %46, %40 : vector<1x4x256xf32>
    %48 = arith.addf %45, %47 : vector<1x4x256xf32>
    %cst_15 = arith.constant 9.99999974E-5 : f32
    %49 = vector.broadcast %cst_15 : f32 to vector<1x4x256xf32>
    %50 = arith.maximumf %48, %49 : vector<1x4x256xf32>
    %51 = math.log %50 : vector<1x4x256xf32>
    %cst_16 = arith.constant 0.000000e+00 : f32
    %52 = vector.broadcast %cst_16 : f32 to vector<1x4x256xf32>
    %cst_17 = arith.constant -9.21034049 : f32
    %53 = vector.broadcast %cst_17 : f32 to vector<1x4x256xf32>
    %54 = arith.maximumf %25, %53 : vector<1x4x256xf32>
    %55 = arith.subf %54, %51 : vector<1x4x256xf32>
    %56 = arith.mulf %22, %55 : vector<1x4x256xf32>
    %cst_18 = arith.constant 5.000000e-01 : f32
    %57 = vector.broadcast %cst_18 : f32 to vector<1x4x256xf32>
    %58 = arith.mulf %57, %56 : vector<1x4x256xf32>
    %59 = arith.addf %52, %58 : vector<1x4x256xf32>
    %cst_19 = arith.constant -9.21034049 : f32
    %60 = vector.broadcast %cst_19 : f32 to vector<1x4x256xf32>
    %61 = arith.maximumf %43, %60 : vector<1x4x256xf32>
    %62 = arith.subf %61, %51 : vector<1x4x256xf32>
    %63 = arith.mulf %40, %62 : vector<1x4x256xf32>
    %cst_20 = arith.constant 5.000000e-01 : f32
    %64 = vector.broadcast %cst_20 : f32 to vector<1x4x256xf32>
    %65 = arith.mulf %64, %63 : vector<1x4x256xf32>
    %66 = arith.addf %59, %65 : vector<1x4x256xf32>
    %c0_21 = arith.constant 0 : index
    %c0_22 = arith.constant 0 : index
    %c0_23 = arith.constant 0 : index
    %67 = vector.load %arg6[%c0_21, %c0_22, %c0_23] : memref<1x4x256xf32, #tpu.memory_space<vmem>>, vector<1x4x256xf32>
    %68 = arith.addf %67, %66 : vector<1x4x256xf32>
    %c0_24 = arith.constant 0 : index
    %c0_25 = arith.constant 0 : index
    %c0_26 = arith.constant 0 : index
    %69 = vector.load %arg6[%c0_24, %c0_25, %c0_26] : memref<1x4x256xf32, #tpu.memory_space<vmem>>, vector<1x4x256xf32>
    tpu.vector_store %arg6[%c0_24, %c0_25, %c0_26], %68 {strides = array<i32>} : memref<1x4x256xf32, #tpu.memory_space<vmem>>, vector<1x4x256xf32>,
    %70 = arith.extui %5 : i1 to i32
    %c0_i32_27 = arith.constant 0 : i32
    %71 = arith.cmpi ne, %70, %c0_i32_27 : i32
    scf.if %71 {
      %c0_28 = arith.constant 0 : index
      %c0_29 = arith.constant 0 : index
      %c0_30 = arith.constant 0 : index
      %72 = vector.load %arg6[%c0_28, %c0_29, %c0_30] : memref<1x4x256xf32, #tpu.memory_space<vmem>>, vector<1x4x256xf32>
      %73 = vector.shape_cast %72 : vector<1x4x256xf32> to vector<1x1x4x256xf32>
      %cst_31 = arith.constant dense<0.000000e+00> : vector<1xf32>
      %74 = vector.multi_reduction <add>, %73, %cst_31 [1, 2, 3] : vector<1x1x4x256xf32> to vector<1xf32>
      %75 = vector.shape_cast %74 : vector<1xf32> to vector<1x1x1x1xf32>
      %76 = vector.extract %75[0, 0, 0, 0] : f32 from vector<1x1x1x1xf32>
      %cst_32 = arith.constant 4.8828125E-4 : f32
      %77 = arith.mulf %76, %cst_32 : f32
      %cst_33 = arith.constant 0.000000e+00 : f32
      %78 = vector.broadcast %cst_33 : f32 to vector<1x1x1xf32>
      %79 = vector.broadcast %77 : f32 to vector<1x1x1xf32>
      %80 = arith.addf %78, %79 : vector<1x1x1xf32>
      %c0_34 = arith.constant 0 : index
      %c0_35 = arith.constant 0 : index
      %c0_36 = arith.constant 0 : index
      %81 = vector.load %arg5[%c0_34, %c0_35, %c0_36] : memref<1x1x1xf32, #tpu.memory_space<vmem>>, vector<1x1x1xf32>
      tpu.vector_store %arg5[%c0_34, %c0_35, %c0_36], %80 {strides = array<i32>} : memref<1x1x1xf32, #tpu.memory_space<vmem>>, vector<1x1x1xf32>,
    } else {
    }
    return
  }
  func.func @transform_0(%arg0: i32, %arg1: i32, %arg2: i32) -> (i32, i32, i32) {
    %c1_i32 = arith.constant 1 : i32
    %0 = arith.muli %arg0, %c1_i32 : i32
    %1 = arith.addi %0, %arg2 : i32
    %c0_i32 = arith.constant 0 : i32
    %c0_i32_0 = arith.constant 0 : i32
    return %arg1, %c0_i32, %1 : i32, i32, i32
  }
  func.func @transform_1(%arg0: i32, %arg1: i32, %arg2: i32) -> (i32, i32, i32) {
    %c1_i32 = arith.constant 1 : i32
    %0 = arith.muli %arg0, %c1_i32 : i32
    %1 = arith.addi %0, %arg2 : i32
    %c0_i32 = arith.constant 0 : i32
    %c0_i32_0 = arith.constant 0 : i32
    return %arg1, %c0_i32, %1 : i32, i32, i32
  }
  func.func @transform_2(%arg0: i32, %arg1: i32, %arg2: i32) -> (i32, i32, i32) {
    %c0_i32 = arith.constant 0 : i32
    %c0_i32_0 = arith.constant 0 : i32
    %c0_i32_1 = arith.constant 0 : i32
    return %arg0, %c0_i32, %c0_i32_0 : i32, i32, i32
  }
}

</mosaic_0001>

<bundles_post_ra>
// kernel: tpu_custom_call.1
= control target key start
LH: loop header
LB: loop body
LE: loop exit
PB: predicated region body
PF: predicated region fallthrough
CT: control target
= control target key end

     0   :  { %7 = vsyncpa [#allocation4], 0  ;;  %s949_s0 = inlined_call_operand.hbm [shape: f32[2,4,256], index: 0, kind: input, shape index: {}]   ;;  %s950_s1 = inlined_call_operand.hbm [shape: f32[2,4,256], index: 1, kind: input, shape index: {}]   ;;  %s951_s2 = inlined_call_operand.hbm [shape: f32[1,1,1], index: 2, kind: output, shape index: {}]  }
   0x1   :  { %9 = vsyncpa [#allocation4 + $0x1], 0 }
   0x2   :  { %10 = vsyncpa [#allocation7], 0 }
   0x3   :  { %12 = vsyncpa [#allocation7 + $0x1], 0 }
   0x4   :  { %13 = vsyncpa [#allocation5], 0  ;;  %s817_s9 = smov 0   ;;  %s819_s10 = smov 0  }
   0x5   :  { %s821_s11 = smov 0   ;;  %s823_s12 = smov 0  }
   0x6   :  { %s825_s13 = smov 0   ;;  %s827_s14 = smov 0  }
   0x7 LB: > { %s538_s15 = sadd.s32 4294967295, %s798_s14   ;;  %s34_s16 = sadd.s32 1, %s794_s13  ;;  %s798_s14 = sphi %s827_s14, %s19_s14   ;;  %s794_s13 = sphi %s825_s13, %s958_s13   ;;  %s790_s12 = sphi %s823_s12, %s957_s12   ;;  %s786_s11 = sphi %s821_s11, %s956_s11   ;;  %s782_s10 = sphi %s819_s10, %s955_s10   ;;  %s778_s9 = sphi %s817_s9, %s954_s9  }
   0x8   : > { %p36_p0 = scmp.ge.s32.totalorder %s34_s16, 2  ;;  %s49_s17 = sadd.s32 1, %s786_s11 }
   0x9   : > { %p56_p1 = scmp.ne.s32.totalorder %s786_s11, %s782_s10  ;;  %p57_p2 = scmp.eq.s32.totalorder %s798_s14, 0 }
   0xa   : > { %s960_s16 = smov (%p36_p0, %s34_s16), 0  ;;  %p62_p4 = scmp.ne.s32.totalorder %s782_s10, %s778_s9 }
   0xb   : > { %p853_p3 = por %p57_p2, %p56_p1  ;;  %s44_s19 = ssub.s32 %s794_s13, %s960_s16 }
   0xc   : > { %p63_p5 = scmp.eq.s32.totalorder %s538_s15, 0  ;;  %p47_p6 = scmp.eq.s32.totalorder %s44_s19, 0 }
   0xd   : > { %p577_p8 = scmp.lt.s32.totalorder %s798_s14, 2  ;;  %s142_s22 = sand.u32 1, %s786_s11  }
   0xe   : > { %p862_p7 = por %p63_p5, %p62_p4  ;;  %s556_s23 = sshll.u32 %s794_s13, 3 }
   0xf   : > { %s868_s21 = scalar_select %p47_p6, %s786_s11, %s49_s17  }
  0x10   : > { %s541_s24 = sshll.u32 %s142_s22, 3  ;;  %s154_s27 = scalar_lea.hbm %s949_s0, %s556_s23 }
  0x11   : > { %s156_s28 = sshll.u32 %s154_s27, 4  ;;  %s146_s29 = scalar_lea.vmem [#allocation3], %s541_s24  ;;  %s157_s28 = int_to_ptr.hbm [resolvable:$true] %s156_s28 }
  0x12   : > { %s158_s30 = sshll.u32 %s146_s29, 4  ;;  %p571_p9 = pnand %p577_p8, %p853_p3  ;;  %s159_s30 = int_to_ptr.vmem [resolvable:$true] %s158_s30 }
  0x13   : > { %p547_p10 = scmp.ge.s32.totalorder %s798_s14, 1  ;;  %p186_p11 = scmp.lt.s32.totalorder %s798_s14, 3 }
  0x14   : > { %s143_s3 = scalar_lea.sflag [#allocation4], %s142_s22  ;;  %s177_s6 = scalar_lea.hbm %s950_s1, %s556_s23 }
  0x15   : > { %573 = dma.hbm_to_vmem [thread:$0]  (!%p571_p9), %s157_s28, 128, %s159_s30, %s143_s3  }
  0x16   : > { %p187_p12 = pnand %p547_p10, %p186_p11  ;;  %s179_s7 = sshll.u32 %s177_s6, 4  ;;  %s180_s7 = int_to_ptr.hbm [resolvable:$true] %s179_s7 }
  0x17   : > { %s169_s8 = scalar_lea.vmem [#allocation6], %s541_s24  ;;  %s166_s17 = scalar_lea.sflag [#allocation7], %s142_s22 }
  0x18   : > { %s181_s9 = sshll.u32 %s169_s8, 4  ;;  %190 = sbr.rel (%p187_p12) target bundleno = 390 (0x186), region = 28  ;;  %s182_s9 = int_to_ptr.vmem [resolvable:$true] %s181_s9 }
  0x19   : > { %576 = dma.hbm_to_vmem [thread:$0]  (!%p571_p9), %s180_s7, 128, %s182_s9, %s166_s17  }
  0x1a   : > { %s192_s18 = sand.u32 (!%p187_p12), 1, %s782_s10  }
  0x1b   : > { %s548_s19 = sshll.u32 (!%p187_p12), %s192_s18, 3  ;;  %s193_s25 = scalar_lea.sflag (!%p187_p12), [#allocation4], %s192_s18 }
  0x1c   : > { %s196_s26 = scalar_lea.vmem (!%p187_p12), [#allocation3], %s548_s19 }
  0x1d   : > { %765 = dma.done.wait (%p862_p7), %s193_s25, 128  }
  0x1e   : > { %767 = vsyncadd (%p862_p7), %s193_s25, 4294967168  ;;  %s203_s23 = scalar_lea.sflag [#allocation7], %s192_s18  ;;  %s887_s24 = scalar_lea.vmem [#allocation6], %s548_s19 }
  0x1f   : > { %769 = dma.done.wait (%p862_p7), %s203_s23, 128  }
  0x20   : > { %771 = vsyncadd (%p862_p7), %s203_s23, 4294967168  ;;  %p232_p13 = scmp.eq.s32.totalorder %s790_s12, 0  ;;  %p236_p0 = scmp.eq.s32.totalorder %s790_s12, 1 }
  0x21   : > { %v800_v0 = vmov (%p232_p13), 0.0  }
  0x22   : > { %240 = sbr.rel (!%p232_p13) target bundleno = 39 (0x27), region = 40  ;;  %241 = vst [vmem:[#allocation2] sm:$0xff] (%p232_p13), %v800_v0 }
  0x27 PF: > { %v242_v1 = vld [vmem:[%s196_s26] sm:$0xff]  ;;  %vm249_vm0 = vcmask 1043456   ;;  %v316_v23 = vld [vmem:[%s887_s24] sm:$0xff]  ;;  %vm432_vm1 = vcmask (%p236_p0), 0  }
  0x28   : > { %244 = vst [vmem:[#allocation1] ss:$2 sm:$0xff] %v242_v1 }
  0x2f   : > { %v245_v2 = vld.sshfl [vmem:[#allocation1] sm:$0xff pattern:$0x75316420]  ;;  %v246_v3 = vld.sshfl [vmem:[#allocation1 + $0x8] sm:$0xff pattern:$0x75316420] }
  0x30   : > { %v250_v4 = vsel %vm249_vm0, %v245_v2, -inf  ;;  %v257_v5 = vsel %vm249_vm0, %v246_v3, -inf }
  0x31   : > { %v251_v6 = vrot.slane %v250_v4, 4  ;;  %v258_v7 = vrot.slane %v257_v5, 4 }
  0x33   : > { %v252_v8 = vmax.f32 %v250_v4, %v251_v6  ;;  %v259_v9 = vmax.f32 %v257_v5, %v258_v7 }
  0x35   : > { %v253_v10 = vrot.slane %v252_v8, 2  ;;  %v260_v11 = vrot.slane %v259_v9, 2 }
  0x37   : > { %v254_v12 = vmax.f32 %v252_v8, %v253_v10  ;;  %v261_v13 = vmax.f32 %v259_v9, %v260_v11 }
  0x39   : > { %v255_v14 = vrot.slane %v254_v12, 1  ;;  %v262_v15 = vrot.slane %v261_v13, 1 }
  0x3b   : > { %v263_v16 = vmax.f32 %v261_v13, %v262_v15  ;;  %v256_v17 = vmax.f32 %v254_v12, %v255_v14 }
  0x3d   : > { %v266_v18 = vrot.slane %v263_v16, 4 }
  0x3f   : > { %v267_v19 = vsel %vm249_vm0, %v256_v17, %v266_v18 }
  0x40   : > { %v898_v20 = vsub.f32 %v242_v1, %v267_v19 }
  0x42   : > { %v270_v21 = vmul.f32 1.442695, %v898_v20 }
  0x44   : > { %630 = vpow2.f32 %v270_v21 }
  0x4a   : > { %v901_v22 = vpop.eup %630 }
  0x4b   : > { %273 = vst [vmem:[#allocation1] ss:$2 sm:$0xff] %v901_v22 }
  0x52   : > { %v274_v24 = vld.sshfl [vmem:[#allocation1] sm:$0xff pattern:$0x75316420]  ;;  %v275_v25 = vld.sshfl [vmem:[#allocation1 + $0x8] sm:$0xff pattern:$0x75316420] }
  0x53   : > { %318 = vst [vmem:[#allocation1] ss:$2 sm:$0xff] %v316_v23  ;;  %v285_v38 = vsel %vm249_vm0, %v275_v25, 0.0  ;;  %v278_v45 = vsel %vm249_vm0, %v274_v24, 0.0 }
  0x54   : > { %v286_v41 = vrot.slane %v285_v38, 4  ;;  %v279_v49 = vrot.slane %v278_v45, 4 }
  0x56   : > { %v287_v46 = vadd.f32 %v286_v41, %v285_v38  ;;  %v280_v52 = vadd.f32 %v279_v49, %v278_v45 }
  0x58   : > { %v288_v51 = vrot.slane %v287_v46, 2  ;;  %v281_v54 = vrot.slane %v280_v52, 2 }
  0x5a   : > { %v319_v26 = vld.sshfl [vmem:[#allocation1] sm:$0xff pattern:$0x75316420]  ;;  %v320_v27 = vld.sshfl [vmem:[#allocation1 + $0x8] sm:$0xff pattern:$0x75316420]  ;;  %v289_v53 = vadd.f32 %v288_v51, %v287_v46  ;;  %v282_v57 = vadd.f32 %v281_v54, %v280_v52 }
  0x5b   : > { %v323_v28 = vsel %vm249_vm0, %v319_v26, -inf  ;;  %v330_v29 = vsel %vm249_vm0, %v320_v27, -inf }
  0x5c   : > { %v324_v30 = vrot.slane %v323_v28, 4  ;;  %v331_v31 = vrot.slane %v330_v29, 4  ;;  %v290_v56 = vrot.slane %v289_v53, 1  ;;  %v283_v59 = vrot.slane %v282_v57, 1 }
  0x5e   : > { %v325_v32 = vmax.f32 %v323_v28, %v324_v30  ;;  %v332_v33 = vmax.f32 %v330_v29, %v331_v31  ;;  %v291_v58 = vadd.f32 %v290_v56, %v289_v53  ;;  %v284_v2 = vadd.f32 %v283_v59, %v282_v57 }
  0x60   : > { %v326_v34 = vrot.slane %v325_v32, 2  ;;  %v333_v35 = vrot.slane %v332_v33, 2 }
  0x62   : > { %v327_v36 = vmax.f32 %v325_v32, %v326_v34  ;;  %v334_v37 = vmax.f32 %v332_v33, %v333_v35 }
  0x64   : > { %v328_v39 = vrot.slane %v327_v36, 1  ;;  %v335_v40 = vrot.slane %v334_v37, 1 }
  0x66   : > { %v336_v42 = vmax.f32 %v334_v37, %v335_v40  ;;  %v329_v43 = vmax.f32 %v327_v36, %v328_v39 }
  0x68   : > { %v339_v44 = vrot.slane %v336_v42, 4 }
  0x6a   : > { %v340_v47 = vsel %vm249_vm0, %v329_v43, %v339_v44 }
  0x6b   : > { %v910_v48 = vsub.f32 %v316_v23, %v340_v47 }
  0x6d   : > { %v343_v50 = vmul.f32 1.442695, %v910_v48 }
  0x6f   : > { %632 = vpow2.f32 %v343_v50 }
  0x70   : > { %634 = vrcp.f32 %v291_v58 }
  0x71   : > { %636 = vrcp.f32 %v284_v2 }
  0x75   : > { %v633_v55 = vpop.eup %632 }
  0x76   : > { %346 = vst [vmem:[#allocation1] ss:$2 sm:$0xff] %v633_v55  ;;  %v635_v7 = vpop.eup %634 }
  0x77   : > { %v295_v10 = vmul.f32 %v635_v7, %v291_v58  ;;  %v637_v15 = vpop.eup %636 }
  0x78   : > { %v294_v17 = vmul.f32 %v637_v15, %v284_v2 }
  0x79   : > { %v297_v16 = vsub.f32 2.0, %v295_v10 }
  0x7a   : > { %v296_v21 = vsub.f32 2.0, %v294_v17 }
  0x7b   : > { %v299_v18 = vmul.f32 %v635_v7, %v297_v16 }
  0x7c   : > { %v298_v27 = vmul.f32 %v637_v15, %v296_v21 }
  0x7d   : > { %v347_v60 = vld.sshfl [vmem:[#allocation1] sm:$0xff pattern:$0x75316420]  ;;  %v348_v61 = vld.sshfl [vmem:[#allocation1 + $0x8] sm:$0xff pattern:$0x75316420] }
  0x7e   : > { %v351_v62 = vsel %vm249_vm0, %v347_v60, 0.0  ;;  %v358_v63 = vsel %vm249_vm0, %v348_v61, 0.0  ;;  %v302_v25 = vrot.slane %v299_v18, 4 }
  0x7f   : > { %v352_v0 = vrot.slane %v351_v62, 4  ;;  %v359_v1 = vrot.slane %v358_v63, 4 }
  0x80   : > { %v303_v30 = vsel %vm249_vm0, %v298_v27, %v302_v25 }
  0x81   : > { %v353_v3 = vadd.f32 %v352_v0, %v351_v62  ;;  %v360_v4 = vadd.f32 %v359_v1, %v358_v63  ;;  %v305_v36 = vmul.f32 %v901_v22, %v303_v30  ;;  %v405_v1 = vld [vmem:[#allocation2] sm:$0xff] }
  0x83   : > { %v354_v5 = vrot.slane %v353_v3, 2  ;;  %v361_v6 = vrot.slane %v360_v4, 2  ;;  %v389_v42 = vmul.f32 0.5, %v305_v36 }
  0x85   : > { %v355_v8 = vadd.f32 %v354_v5, %v353_v3  ;;  %v362_v9 = vadd.f32 %v361_v6, %v360_v4 }
  0x87   : > { %v356_v11 = vrot.slane %v355_v8, 1  ;;  %v363_v12 = vrot.slane %v362_v9, 1 }
  0x89   : > { %v357_v13 = vadd.f32 %v356_v11, %v355_v8  ;;  %v364_v14 = vadd.f32 %v363_v12, %v362_v9 }
  0x8b   : > { %638 = vrcp.f32 %v357_v13 }
  0x8c   : > { %640 = vrcp.f32 %v364_v14 }
  0x8d   : > { %642 = vlog2.f32 %v291_v58 }
  0x8e   : > { %644 = vlog2.f32 %v364_v14 }
  0x8f   : > { %646 = vlog2.f32 %v284_v2 }
  0x90   : > { %648 = vlog2.f32 %v357_v13 }
  0x91   : > { %v639_v19 = vpop.eup %638 }
  0x92   : > { %v641_v23 = vpop.eup %640  ;;  %v367_v24 = vmul.f32 %v639_v19, %v357_v13 }
  0x93   : > { %v368_v26 = vmul.f32 %v641_v23, %v364_v14  ;;  %v643_v32 = vpop.eup %642 }
  0x94   : > { %v369_v28 = vsub.f32 2.0, %v367_v24  ;;  %v645_v33 = vpop.eup %644  ;;  %v309_v38 = vmul.f32 0.6931472, %v643_v32 }
  0x95   : > { %v370_v29 = vsub.f32 2.0, %v368_v26  ;;  %v382_v40 = vmul.f32 0.6931472, %v645_v33  ;;  %v647_v41 = vpop.eup %646 }
  0x96   : > { %v371_v34 = vmul.f32 %v639_v19, %v369_v28  ;;  %v649_v44 = vpop.eup %648  ;;  %v312_v45 = vrot.slane %v309_v38, 4  ;;  %v307_v49 = vmul.f32 0.6931472, %v647_v41 }
  0x97   : > { %v372_v31 = vmul.f32 %v641_v23, %v370_v29  ;;  %v385_v46 = vrot.slane %v382_v40, 4  ;;  %v380_v50 = vmul.f32 0.6931472, %v649_v44 }
  0x98   : > { %v313_v52 = vsel %vm249_vm0, %v307_v49, %v312_v45 }
  0x99   : > { %v375_v35 = vrot.slane %v372_v31, 4  ;;  %v386_v53 = vsel %vm249_vm0, %v380_v50, %v385_v46  ;;  %v315_v22 = vsub.f32 %v898_v20, %v313_v52 }
  0x9a   : > { %v388_v54 = vsub.f32 %v910_v48, %v386_v53 }
  0x9b   : > { %v376_v37 = vsel %vm249_vm0, %v371_v34, %v375_v35  ;;  %v395_v57 = vmax.f32 %v315_v22, -9.2103405 }
  0x9c   : > { %v378_v39 = vmul.f32 %v633_v55, %v376_v37  ;;  %v400_v58 = vmax.f32 %v388_v54, -9.2103405 }
  0x9e   : > { %v390_v43 = vmul.f32 0.5, %v378_v39 }
  0xa0   : > { %v391_v47 = vadd.f32 %v390_v43, %v389_v42 }
  0xa2   : > { %v392_v51 = vmax.f32 %v391_v47, 0.0001 }
  0xa4   : > { %650 = vlog2.f32 %v392_v51 }
  0xaa   : > { %v651_v55 = vpop.eup %650 }
  0xab   : > { %v394_v56 = vmul.f32 0.6931472, %v651_v55 }
  0xad   : > { %v396_v59 = vsub.f32 %v395_v57, %v394_v56  ;;  %v401_v60 = vsub.f32 %v400_v58, %v394_v56 }
  0xaf   : > { %v397_v61 = vmul.f32 %v396_v59, %v305_v36  ;;  %v402_v62 = vmul.f32 %v401_v60, %v378_v39 }
  0xb1   : > { %v398_v63 = vmul.f32 0.5, %v397_v61  ;;  %v403_v0 = vmul.f32 0.5, %v402_v62 }
  0xb3   : > { %v404_v2 = vadd.f32 %v403_v0, %v398_v63  ;;  %409 = sbr.rel (!%p236_p0) target bundleno = 384 (0x180), region = 44 }
  0xb5   : > { %v406_v3 = vadd.f32 %v405_v1, %v404_v2 }
  0xb7   : > { %407 = vst [vmem:[#allocation2] sm:$0xff] %v406_v3 }
  0xbe   : > { %v410_v20 = vld [vmem:[#allocation2] sm:$0xff] }
  0xbf   : > { %412 = vst [vmem:[#allocation1] ss:$2 sm:$0xff] %v410_v20 }
  0xc6   : > { %v413_v48 = vld.sshfl [vmem:[#allocation1] sm:$0xff pattern:$0x75316420]  ;;  %v414_v4 = vld.sshfl [vmem:[#allocation1 + $0x8] sm:$0xff pattern:$0x75316420] }
  0xc7   : > { %v417_v5 = vsel %vm249_vm0, %v413_v48, 0.0  ;;  %v418_v6 = vsel %vm249_vm0, %v414_v4, 0.0 }
  0xc8   : > { %v419_v7 = vadd.f32 %v418_v6, %v417_v5 }
  0xca   : > { %420 = vadd.xlane.f32.xlu0 %v419_v7 }
 0x13d   : > { %v421_v8 = vpop.xlane.xlu0 %420 }
 0x13e   : > { %v422_v9 = vrot.slane %v421_v8, 4 }
 0x140   : > { %v423_v10 = vadd.f32 %v422_v9, %v421_v8 }
 0x142   : > { %v424_v11 = vrot.slane %v423_v10, 2 }
 0x144   : > { %v425_v12 = vadd.f32 %v424_v11, %v423_v10 }
 0x146   : > { %v426_v13 = vrot.slane %v425_v12, 1 }
 0x148   : > { %v427_v14 = vadd.f32 %v426_v13, %v425_v12 }
 0x14a   : > { %560 = vpush %v427_v14 }
 0x17b   : > { %s561_s12 = spop %560 }
 0x17c   : > { %s429_s20 = smul.f32 0.00048828125, %s561_s12 }
 0x17e   : > { %v430_v15 = vstv %s429_s20 }
 0x17f   : > { %433 = vst.msk [vmem:[#allocation8] sm:$0x1] %vm432_vm1, %v430_v15 }
 0x180 PF: > { %p578_p1 = scmp.eq.s32.totalorder %s538_s15, 1  ;;  %s443_s28 = sshll.u32 %s951_s2, 4  ;;  %s444_s28 = int_to_ptr.hbm [resolvable:$true] %s443_s28 }
 0x181   : > { %s801_s29 = smov [#allocation8]  }
 0x182   : > { %s441_s30 = sshll.u32 %s801_s29, 4  ;;  %s442_s30 = int_to_ptr.vmem [resolvable:$true] %s441_s30 }
 0x183   : > { %567 = dma.vmem_to_hbm [thread:$0]  (%p578_p1), %s442_s30, 16, %s444_s28, [#allocation5]  }
 0x184   : > { %773 = dma.done.wait (%p578_p1), [#allocation5], 16  }
 0x185   : > { %775 = vsyncadd (%p578_p1), [#allocation5], 4294967280 }
 0x186 PF: > { %s19_s14 = sadd.s32 1, %s798_s14   ;;  %s954_s9 = smov %s782_s10 }
 0x187   : > { %p16_p2 = scmp.ge.s32.totalorder %s19_s14, 4   ;;  %s955_s10 = smov %s786_s11 }
 0x188   : > { %s956_s11 = smov %s868_s21  ;;  %s957_s12 = smov %s794_s13 }
 0x189   : > { %s958_s13 = smov %s960_s16  ;;  %18 = sbr.rel (!%p16_p2) target bundleno = 7 (0x7), region = 87 }
 0x18e   :  { %457 = vsyncpa [#allocation4], 1 }
 0x18f   :  { %459 = vsyncpa [#allocation4 + $0x1], 1 }
 0x190   :  { %460 = vsyncpa [#allocation7], 1 }
 0x191   :  { %462 = vsyncpa [#allocation7 + $0x1], 1 }
 0x192   :  { %463 = vsyncpa [#allocation5], 1 }
 0x193   :  { %465 = vsyncpa [#allocation5 + $0x1], 1 }

</bundles_post_ra>
